<compile_context>
chip_gen: v5e
topology: v5e:2x2
jax: 0.10.0
libtpu: 0.0.40
codegen_flags: <defaults>
</compile_context>

<pallas_src>
import functools
import math

import jax
import jax.numpy as jnp
from jax.experimental import pallas as pl
from jax.experimental.pallas import tpu as pltpu


def _round_up(x, m):
    return ((x + m - 1) // m) * m


def _pick_k_tile(n_pad, target):
    """Largest K tile <= target that divides n_pad and keeps (8,128) layout."""
    if n_pad <= target:
        return n_pad
    t = (target // 128) * 128
    for cand in range(t, 0, -128):
        if n_pad % cand == 0:
            return cand
    return n_pad  # fall back to a single K step (block == full contraction dim)


def _vmem_limit(nbytes):
    """Generation-aware scoped-VMEM request with headroom for Mosaic scratch."""
    cap = 64 << 20  # conservative fallback: v7x per-TensorCore physical VMEM
    try:
        cap = int(pltpu.get_tpu_info().vmem_capacity_bytes)
    except Exception:
        pass
    ceiling = max(int(0.85 * cap), 32 << 20)
    return int(min(max(nbytes, 32 << 20), ceiling))


# ---------------------------------------------------------------------------
# Kernel 1: projection  support = X @ W   (small: N * F_in * F_out flops)
# ---------------------------------------------------------------------------
def _project_kernel(x_ref, w_ref, s_ref, *, compute_dtype):
    s_ref[...] = jnp.dot(
        x_ref[...].astype(compute_dtype),
        w_ref[...].astype(compute_dtype),
        preferred_element_type=jnp.float32,
    ).astype(s_ref.dtype)


# ---------------------------------------------------------------------------
# Kernel 2: aggregation  out_tile = adj_tile @ support + bias  (dominant N^2)
#           K-tiled with an f32 VMEM accumulator.
# ---------------------------------------------------------------------------
def _aggregate_kernel(adj_ref, s_ref, b_ref, o_ref, acc_ref, *, compute_dtype):
    k = pl.program_id(1)

    @pl.when(k == 0)
    def _():
        acc_ref[...] = jnp.zeros_like(acc_ref)

    # In-kernel cast of the adj tile (single f32 HBM pass for adj; the VPU
    # cast hides under the MXU matmul).  support is already compute_dtype.
    acc_ref[...] += jnp.dot(
        adj_ref[...].astype(compute_dtype),
        s_ref[...],
        preferred_element_type=jnp.float32,
    )

    @pl.when(k == pl.num_programs(1) - 1)
    def _():
        o_ref[...] = (acc_ref[...] + b_ref[...]).astype(o_ref.dtype)


def graph_convolution(x, adj, weight, bias=None, *, row_tile=256, k_tile=1024,
                      compute_dtype=jnp.bfloat16):
    """adj @ (x @ weight) + bias computed with two Pallas TPU kernels."""
    n, f_in = x.shape
    f_out = weight.shape[1]
    assert adj.shape == (n, n)
    assert weight.shape[0] == f_in
    assert row_tile % 8 == 0

    out_dtype = x.dtype
    if bias is None:
        bias = jnp.zeros((f_out,), dtype=jnp.float32)

    # ---- TPU-friendly shapes: lane-dense F_out, 8-aligned row tiles --------
    row_tile_eff = min(row_tile, _round_up(n, 8))
    n_pad = _round_up(n, row_tile_eff)
    f_out_pad = _round_up(f_out, 128)
    k_tile_eff = _pick_k_tile(n_pad, max(k_tile, row_tile_eff))

    # Single HBM pass over adj: no wrapper astype, pad only when required.
    if n_pad != n:
        x_p = jnp.pad(x, ((0, n_pad - n), (0, 0)))
        adj_p = jnp.pad(adj, ((0, n_pad - n), (0, n_pad - n)))
    else:
        x_p, adj_p = x, adj
    if f_out_pad != f_out:
        w_p = jnp.pad(weight, ((0, 0), (0, f_out_pad - f_out)))
        b_p = jnp.pad(bias.astype(jnp.float32), (0, f_out_pad - f_out))
    else:
        w_p = weight
        b_p = bias.astype(jnp.float32)
    b_p = b_p.reshape(1, f_out_pad)

    csize = jnp.dtype(compute_dtype).itemsize
    osize = jnp.dtype(out_dtype).itemsize

    # ---- 1) support = X @ W  (compute_dtype MXU inputs, f32 accumulate) ----
    proj_vmem = (2 * row_tile_eff * f_in * x_p.dtype.itemsize
                 + 2 * f_in * f_out_pad * w_p.dtype.itemsize
                 + 2 * row_tile_eff * f_out_pad * csize
                 + (2 << 20))
    support = pl.pallas_call(
        functools.partial(_project_kernel, compute_dtype=compute_dtype),
        out_shape=jax.ShapeDtypeStruct((n_pad, f_out_pad), compute_dtype),
        grid=(n_pad // row_tile_eff,),
        in_specs=[
            pl.BlockSpec((row_tile_eff, f_in), lambda i: (i, 0)),
            pl.BlockSpec((f_in, f_out_pad), lambda i: (0, 0)),
        ],
        out_specs=pl.BlockSpec((row_tile_eff, f_out_pad), lambda i: (i, 0)),
        compiler_params=pltpu.CompilerParams(
            dimension_semantics=("parallel",),
            vmem_limit_bytes=_vmem_limit(proj_vmem),
        ),
    )(x_p, w_p)

    # ---- 2) out = adj @ support + bias  (K-tiled, f32 accumulator) ---------
    agg_vmem = (2 * row_tile_eff * k_tile_eff * adj_p.dtype.itemsize  # adj tiles
                + 2 * k_tile_eff * f_out_pad * csize                  # support
                + 2 * row_tile_eff * f_out_pad * osize                # out tiles
                + row_tile_eff * f_out_pad * 4                        # accumulator
                + 2 * f_out_pad * 4                                   # bias
                + (2 << 20))                                          # headroom
    out_p = pl.pallas_call(
        functools.partial(_aggregate_kernel, compute_dtype=compute_dtype),
        out_shape=jax.ShapeDtypeStruct((n_pad, f_out_pad), out_dtype),
        grid=(n_pad // row_tile_eff, n_pad // k_tile_eff),
        in_specs=[
            pl.BlockSpec((row_tile_eff, k_tile_eff), lambda i, k: (i, k)),
            pl.BlockSpec((k_tile_eff, f_out_pad), lambda i, k: (k, 0)),
            pl.BlockSpec((1, f_out_pad), lambda i, k: (0, 0)),
        ],
        out_specs=pl.BlockSpec((row_tile_eff, f_out_pad), lambda i, k: (i, 0)),
        scratch_shapes=[pltpu.VMEM((row_tile_eff, f_out_pad), jnp.float32)],
        compiler_params=pltpu.CompilerParams(
            dimension_semantics=("parallel", "arbitrary"),
            vmem_limit_bytes=_vmem_limit(agg_vmem),
        ),
    )(adj_p, support, b_p)

    if n_pad != n or f_out_pad != f_out:
        out_p = out_p[:n, :f_out]
    return out_p


if __name__ == "__main__":
    # Small, TPU-friendly shapes consistent with the module's forward:
    #   N (num nodes) = 512, in_features = 64, out_features = 128
    N, F_IN, F_OUT = 512, 64, 128

    key = jax.random.PRNGKey(0)
    k_x, k_adj, k_w, k_b = jax.random.split(key, 4)

    # Parameter init mirroring reset_parameters(): uniform(-stdv, stdv),
    # stdv = 1 / sqrt(out_features).
    stdv = 1.0 / math.sqrt(F_OUT)
    weight = jax.random.uniform(
        k_w, (F_IN, F_OUT), dtype=jnp.float32, minval=-stdv, maxval=stdv)
    bias = jax.random.uniform(
        k_b, (F_OUT,), dtype=jnp.float32, minval=-stdv, maxval=stdv)

    # Example inputs: node features + (dense) row-normalized adjacency.
    x = jax.random.normal(k_x, (N, F_IN), dtype=jnp.float32)
    adj = jax.random.uniform(k_adj, (N, N), dtype=jnp.float32)
    adj = adj / jnp.sum(adj, axis=-1, keepdims=True)

    ref = adj @ (x @ weight) + bias

    # Performance path: bf16 streaming matmul, f32 accumulation.
    out_bf16 = jax.block_until_ready(
        graph_convolution(x, adj, weight, bias, compute_dtype=jnp.bfloat16))
    assert out_bf16.shape == (N, F_OUT)
    assert jnp.allclose(out_bf16, ref, atol=1e-2, rtol=1e-2), \
        "bf16 path mismatch vs reference"

    # Exact-semantics path: full f32 (in-kernel casts are no-ops).
    out_f32 = jax.block_until_ready(
        graph_convolution(x, adj, weight, bias, compute_dtype=jnp.float32))
    assert jnp.allclose(out_f32, ref, atol=1e-4, rtol=1e-4), \
        "f32 path mismatch vs reference"

    print("KERNEL_OK")
</pallas_src>

<mosaic_0001>
module attributes {stable_mosaic.version = 11 : i64} {
  func.func @_project_kernel(%arg0: i32, %arg1: memref<256x64xf32, #tpu.memory_space<vmem>>, %arg2: memref<64x128xf32, #tpu.memory_space<vmem>>, %arg3: memref<256x128xbf16, #tpu.memory_space<vmem>>) attributes {dimension_semantics = [#tpu.dimension_semantics<parallel>], iteration_bounds = array<i64: 2>, scalar_prefetch = 0 : i64, scratch_operands = 0 : i64, tpu.core_type = #tpu.core_type<tc>, window_params = [{transform_indices = @transform_0, window_bounds = array<i64: 256, 64>}, {pipeline_mode = #tpu.pipeline_mode<synchronous>, transform_indices = @transform_1, window_bounds = array<i64: 64, 128>}, {transform_indices = @transform_2, window_bounds = array<i64: 256, 128>}]} {
    %c0 = arith.constant 0 : index
    %c0_0 = arith.constant 0 : index
    %0 = vector.load %arg1[%c0, %c0_0] : memref<256x64xf32, #tpu.memory_space<vmem>>, vector<256x64xf32>
    %1 = arith.truncf %0 : vector<256x64xf32> to vector<256x64xbf16>
    %c0_1 = arith.constant 0 : index
    %c0_2 = arith.constant 0 : index
    %2 = vector.load %arg2[%c0_1, %c0_2] : memref<64x128xf32, #tpu.memory_space<vmem>>, vector<64x128xf32>
    %3 = arith.truncf %2 : vector<64x128xf32> to vector<64x128xbf16>
    %cst = arith.constant dense<0.000000e+00> : vector<256x128xf32>
    %4 = tpu.matmul %1, %3, %cst {dimension_numbers = #tpu.dot_dimension_numbers<[1], [0], [0], [1], [0, 0, 1, 1], [], []>} : vector<256x64xbf16>, vector<64x128xbf16>, vector<256x128xf32> -> vector<256x128xf32>
    %5 = arith.truncf %4 : vector<256x128xf32> to vector<256x128xbf16>
    %c0_3 = arith.constant 0 : index
    %c0_4 = arith.constant 0 : index
    %6 = vector.load %arg3[%c0_3, %c0_4] : memref<256x128xbf16, #tpu.memory_space<vmem>>, vector<256x128xbf16>
    tpu.vector_store %arg3[%c0_3, %c0_4], %5 {strides = array<i32>} : memref<256x128xbf16, #tpu.memory_space<vmem>>, vector<256x128xbf16>,
    return
  }
  func.func @transform_0(%arg0: i32) -> (i32, i32) {
    %c0_i32 = arith.constant 0 : i32
    %c0_i32_0 = arith.constant 0 : i32
    return %arg0, %c0_i32 : i32, i32
  }
  func.func @transform_1(%arg0: i32) -> (i32, i32) {
    %c0_i32 = arith.constant 0 : i32
    %c0_i32_0 = arith.constant 0 : i32
    %c0_i32_1 = arith.constant 0 : i32
    return %c0_i32, %c0_i32_0 : i32, i32
  }
  func.func @transform_2(%arg0: i32) -> (i32, i32) {
    %c0_i32 = arith.constant 0 : i32
    %c0_i32_0 = arith.constant 0 : i32
    return %arg0, %c0_i32 : i32, i32
  }
}

</mosaic_0001>

<bundles_post_ra>
// kernel: tpu_custom_call.1
= control target key start
LH: loop header
LB: loop body
LE: loop exit
PB: predicated region body
PF: predicated region fallthrough
CT: control target
= control target key end

     0   :  { %7 = vsyncpa [#allocation3], 0  ;;  %s925_s0 = inlined_call_operand.vmem [shape: f32[512,64], index: 0, kind: input, shape index: {}]   ;;  %s926_s1 = inlined_call_operand.vmem [shape: f32[64,128], index: 1, kind: input, shape index: {}]   ;;  %s927_s2 = inlined_call_operand.hbm [shape: bf16[512,128], index: 2, kind: output, shape index: {}]  }
   0x1   :  { %9 = vsyncpa [#allocation3 + $0x1], 0  ;;  %s744_s9 = smov 0   ;;  %s746_s10 = smov 0  }
   0x2   :  { %s748_s11 = smov 0   ;;  %s750_s12 = smov 0  }
   0x3 LB: > { %s765_s13 = sadd.s32 4294967295, %s725_s12   ;;  %s486_s14 = sadd.s32 4294967294, %s725_s12   ;;  %s725_s12 = sphi %s750_s12, %s933_s12   ;;  %s721_s11 = sphi %s748_s11, %s932_s11   ;;  %s717_s10 = sphi %s746_s10, %s931_s10   ;;  %s713_s9 = sphi %s744_s9, %s930_s9  }
   0x4   : > { %s769_s15 = sadd.s32 1, %s725_s12   ;;  %s69_s16 = sadd.s32 1, %s721_s11 }
   0x5   : > { %s66_s17 = ssub.s32 %s725_s12, %s769_s15  ;;  %p79_p0 = scmp.ne.s32.totalorder %s721_s11, %s717_s10 }
   0x6   : > { %p67_p1 = scmp.eq.s32.totalorder %s66_s17, 0  ;;  %p80_p2 = scmp.eq.s32.totalorder %s765_s13, 1 }
   0x7   : > { %p85_p3 = scmp.ne.s32.totalorder %s717_s10, %s713_s9  ;;  %p86_p4 = scmp.eq.s32.totalorder %s486_s14, 1 }
   0x8   : > { %s780_s18 = scalar_select %p67_p1, %s721_s11, %s69_s16  }
   0x9   : > { %p782_p5 = por %p80_p2, %p79_p0  ;;  %p786_p6 = por %p86_p4, %p85_p3 }
   0xa   : > { %p489_p7 = scmp.ge.s32.totalorder %s725_s12, 1  ;;  %p116_p8 = scmp.lt.s32.totalorder %s725_s12, 3 }
   0xc   : > { %p117_p9 = pnand %p489_p7, %p116_p8 }
   0xd   : > { %s491_s27 = sshll.u32 (!%p117_p9), %s765_s13, 5  ;;  %s135_s23 = sand.u32 (!%p117_p9), 1, %s717_s10  }
   0xe   : > { %120 = sbr.rel (%p117_p9) target bundleno = 233 (0xe9), region = 28  ;;  %p139_p10 = scmp.lt.s32.totalorder (!%p117_p9), %s491_s27, 63 }
   0xf   : > { %s490_s24 = sshll.u32 (!%p117_p9), %s135_s23, 7  ;;  %s514_s26 = sshll.u32 (!%p117_p9), %s765_s13, 7 }
  0x10   : > { %s873_s25 = scalar_lea.vmem (!%p117_p9), [#allocation2], %s490_s24  ;;  %s420_s29 = scalar_lea.hbm (!%p117_p9), %s927_s2, %s514_s26 }
  0x11   : > { %s421_s30 = sshll.u32 (!%p117_p9), %s873_s25, 4  ;;  %s423_s3 = sshll.u32 (!%p117_p9), %s420_s29, 4  ;;  %s422_s30 = int_to_ptr.vmem [resolvable:$true] %s421_s30  ;;  %s424_s3 = int_to_ptr.hbm [resolvable:$true] %s423_s3 }
  0x12   : > { %s409_s13 = scalar_lea.sflag (!%p117_p9), [#allocation3], %s135_s23  ;;  %s677_s4 = sshra.s32 (!%p117_p9), %s424_s3, 4  ;;  %s678_s4 = int_to_ptr.hbm [resolvable:$true] %s677_s4 }
  0x13   : > { %v200_v0 = vld [vmem:[%s926_s1 + $0x30] sm:$0xff]  ;;  %v201_v1 = vld [vmem:[%s926_s1 + $0x38] sm:$0xff]  ;;  %v198_v2 = vld [vmem:[%s926_s1 + $0x20] sm:$0xff]  ;;  %s935_s27 = smov (!%p139_p10, %s491_s27), 63  ;;  %vm206_vm0 = vcmask 523264   ;;  %s679_s5 = scalar_lea.hbm %s678_s4, 128 }
  0x14   : > { %v205_v3 = vpack.c.bf16 %v201_v1, %v200_v0  ;;  %v199_v4 = vld [vmem:[%s926_s1 + $0x28] sm:$0xff]  ;;  %v196_v6 = vld [vmem:[%s926_s1 + $0x10] sm:$0xff]  ;;  %v197_v7 = vld [vmem:[%s926_s1 + $0x18] sm:$0xff]  ;;  %s492_s6 = sshll.u32 %s935_s27, 3  ;;  %p680_p11 = scmp.ne.s32.totalorder %s678_s4, %s679_s5 }
  0x15   : > { %v204_v5 = vpack.c.bf16 %v199_v4, %v198_v2  ;;  %v203_v8 = vpack.c.bf16 %v197_v7, %v196_v6  ;;  %s814_s14 = scalar_lea.vmem %s925_s0, %s492_s6  ;;  %v194_v9 = vld [vmem:[%s926_s1] sm:$0xff]  ;;  %v195_v10 = vld [vmem:[%s926_s1 + $0x8] sm:$0xff]  ;;  %s683_s8 = scalar_lea.hbm %s927_s2, 256 }
  0x16   : > { %259 = vmatpush.bf16.msra.mxu0 %v205_v3  ;;  %610 = vmatpush.bf16.msra.mxu1 %v205_v3  ;;  %v146_v11 = vld [vmem:[%s814_s14] sm:$0xff]  ;;  %v147_v12 = vld [vmem:[%s814_s14 + $0x8] sm:$0xff]  ;;  %v202_v13 = vpack.c.bf16 %v195_v10, %v194_v9  ;;  %v148_v24 = vld [vmem:[%s814_s14 + $0x10] sm:$0xff]  ;;  %p681_p12 = pnand %p680_p11, %p782_p5  ;;  %p684_p0 = scmp.lt.s32.totalorder %s678_s4, %s927_s2 }
  0x17   : > { %611 = vmatpush.bf16.msra.mxu2 %v205_v3  ;;  %612 = vmatpush.bf16.msra.mxu3 %v205_v3  ;;  %v154_v14 = vld [vmem:[%s814_s14 + $0x40] sm:$0xff]  ;;  %v155_v15 = vld [vmem:[%s814_s14 + $0x48] sm:$0xff]  ;;  %v178_v20 = vpack.c.bf16 %v147_v12, %v146_v11  ;;  %v149_v25 = vld [vmem:[%s814_s14 + $0x18] sm:$0xff]  ;;  %p685_p1 = scmp.lt.s32.totalorder %s683_s8, %s679_s5 }
  0x18   : > { %v162_v16 = vld [vmem:[%s814_s14 + $0x80] sm:$0xff]  ;;  %v163_v17 = vld [vmem:[%s814_s14 + $0x88] sm:$0xff]  ;;  %v182_v21 = vpack.c.bf16 %v155_v15, %v154_v14  ;;  %v156_v26 = vld [vmem:[%s814_s14 + $0x50] sm:$0xff]  ;;  %v179_v32 = vpack.c.bf16 %v149_v25, %v148_v24  ;;  %p682_p13 = pneg %p681_p12 }
  0x19   : > { %v170_v18 = vld [vmem:[%s814_s14 + $0xc0] sm:$0xff]  ;;  %v171_v19 = vld [vmem:[%s814_s14 + $0xc8] sm:$0xff]  ;;  %v186_v22 = vpack.c.bf16 %v163_v17, %v162_v16  ;;  %v157_v27 = vld [vmem:[%s814_s14 + $0x58] sm:$0xff]  ;;  %p686_p2 = por %p685_p1, %p684_p0 }
  0x1a   : > { %260 = vmatpush.bf16.msra.mxu0 %v204_v5  ;;  %613 = vmatpush.bf16.msra.mxu1 %v204_v5  ;;  %v190_v23 = vpack.c.bf16 %v171_v19, %v170_v18  ;;  %v164_v28 = vld [vmem:[%s814_s14 + $0x90] sm:$0xff]  ;;  %v165_v29 = vld [vmem:[%s814_s14 + $0x98] sm:$0xff]  ;;  %v183_v33 = vpack.c.bf16 %v157_v27, %v156_v26  ;;  %v150_v36 = vld [vmem:[%s814_s14 + $0x20] sm:$0xff] }
  0x1b   : > { %614 = vmatpush.bf16.msra.mxu2 %v204_v5  ;;  %615 = vmatpush.bf16.msra.mxu3 %v204_v5  ;;  %v172_v30 = vld [vmem:[%s814_s14 + $0xd0] sm:$0xff]  ;;  %v173_v31 = vld [vmem:[%s814_s14 + $0xd8] sm:$0xff]  ;;  %v187_v34 = vpack.c.bf16 %v165_v29, %v164_v28  ;;  %v151_v37 = vld [vmem:[%s814_s14 + $0x28] sm:$0xff]  ;;  %p687_p3 = pnand %p686_p2, %p682_p13 }
  0x1c   : > { %v191_v35 = vpack.c.bf16 %v173_v31, %v172_v30  ;;  %v158_v38 = vld [vmem:[%s814_s14 + $0x60] sm:$0xff]  ;;  %v159_v39 = vld [vmem:[%s814_s14 + $0x68] sm:$0xff]  ;;  %v180_v44 = vpack.c.bf16 %v151_v37, %v150_v36  ;;  %v152_v48 = vld [vmem:[%s814_s14 + $0x30] sm:$0xff] }
  0x1d   : > { %v166_v40 = vld [vmem:[%s814_s14 + $0xa0] sm:$0xff]  ;;  %v167_v41 = vld [vmem:[%s814_s14 + $0xa8] sm:$0xff]  ;;  %v184_v45 = vpack.c.bf16 %v159_v39, %v158_v38  ;;  %v153_v49 = vld [vmem:[%s814_s14 + $0x38] sm:$0xff] }
  0x1e   : > { %261 = vmatpush.bf16.msra.mxu0 %v203_v8  ;;  %616 = vmatpush.bf16.msra.mxu1 %v203_v8  ;;  %v174_v42 = vld [vmem:[%s814_s14 + $0xe0] sm:$0xff]  ;;  %v175_v43 = vld [vmem:[%s814_s14 + $0xe8] sm:$0xff]  ;;  %v188_v46 = vpack.c.bf16 %v167_v41, %v166_v40  ;;  %v160_v50 = vld [vmem:[%s814_s14 + $0x70] sm:$0xff]  ;;  %v181_v56 = vpack.c.bf16 %v153_v49, %v152_v48 }
  0x1f   : > { %617 = vmatpush.bf16.msra.mxu2 %v203_v8  ;;  %618 = vmatpush.bf16.msra.mxu3 %v203_v8  ;;  %v192_v47 = vpack.c.bf16 %v175_v43, %v174_v42  ;;  %v161_v51 = vld [vmem:[%s814_s14 + $0x78] sm:$0xff]  ;;  %v168_v52 = vld [vmem:[%s814_s14 + $0xb0] sm:$0xff] }
  0x20   : > { %v169_v53 = vld [vmem:[%s814_s14 + $0xb8] sm:$0xff]  ;;  %v176_v54 = vld [vmem:[%s814_s14 + $0xf0] sm:$0xff]  ;;  %v185_v57 = vpack.c.bf16 %v161_v51, %v160_v50 }
  0x21   : > { %v177_v55 = vld [vmem:[%s814_s14 + $0xf8] sm:$0xff]  ;;  %v189_v58 = vpack.c.bf16 %v169_v53, %v168_v52 }
  0x22   : > { %262 = vmatpush.bf16.msra.mxu0 %v202_v13  ;;  %619 = vmatpush.bf16.msra.mxu1 %v202_v13  ;;  %v193_v59 = vpack.c.bf16 %v177_v55, %v176_v54 }
  0x23   : > { %620 = vmatpush.bf16.msra.mxu2 %v202_v13  ;;  %621 = vmatpush.bf16.msra.mxu3 %v202_v13 }
  0x25   : > { %493 = vmatmul.msk.bf16.vlgmr.msra.gmra.mxu0 %vm206_vm0, %v178_v20  ;;  %497 = vmatmul.msk.bf16.vlgmr.msra.gmra.mxu1 %vm206_vm0, %v182_v21 }
  0x26   : > { %501 = vmatmul.msk.bf16.vlgmr.msra.gmra.mxu2 %vm206_vm0, %v186_v22  ;;  %505 = vmatmul.msk.bf16.vlgmr.msra.gmra.mxu3 %vm206_vm0, %v190_v23 }
  0x35   : > { %494 = vmatmul.msk.bf16.gmra.mxu0 %vm206_vm0, %v179_v32  ;;  %498 = vmatmul.msk.bf16.gmra.mxu1 %vm206_vm0, %v183_v33 }
  0x36   : > { %502 = vmatmul.msk.bf16.gmra.mxu2 %vm206_vm0, %v187_v34  ;;  %506 = vmatmul.msk.bf16.gmra.mxu3 %vm206_vm0, %v191_v35 }
  0x45   : > { %495 = vmatmul.msk.bf16.gmra.mxu0 %vm206_vm0, %v180_v44  ;;  %499 = vmatmul.msk.bf16.gmra.mxu1 %vm206_vm0, %v184_v45 }
  0x46   : > { %503 = vmatmul.msk.bf16.gmra.mxu2 %vm206_vm0, %v188_v46  ;;  %507 = vmatmul.msk.bf16.gmra.mxu3 %vm206_vm0, %v192_v47 }
  0x55   : > { %496 = vmatmul.msk.bf16.gmra.mxu0 %vm206_vm0, %v181_v56  ;;  %500 = vmatmul.msk.bf16.gmra.mxu1 %vm206_vm0, %v185_v57 }
  0x56   : > { %504 = vmatmul.msk.bf16.gmra.mxu2 %vm206_vm0, %v189_v58  ;;  %508 = vmatmul.msk.bf16.gmra.mxu3 %vm206_vm0, %v193_v59 }
  0xa2   : > { %v264_v60 = vpop.f32.mrf.mxu0  ;;  %v284_v61 = vpop.f32.mrf.mxu1 }
  0xa9   : > { %v304_v62 = vpop.f32.mrf.mxu2  ;;  %v324_v63 = vpop.f32.mrf.mxu3 }
  0xaa   : > { %v266_v0 = vpop.f32.mrf.mxu0  ;;  %v286_v1 = vpop.f32.mrf.mxu1 }
  0xab   : > { %v518_v2 = vpack.c.bf16 %v266_v0, %v264_v60  ;;  %v538_v3 = vpack.c.bf16 %v286_v1, %v284_v61 }
  0xad   : > { %519 = vst [vmem:[%s873_s25] sm:$0xff] %v518_v2  }
  0xae   : > { %598 = vst [vmem:[%s873_s25 + $0x20] sm:$0xff] %v538_v3  }
  0xb1   : > { %v306_v4 = vpop.f32.mrf.mxu2  ;;  %v326_v5 = vpop.f32.mrf.mxu3 }
  0xb2   : > { %v558_v6 = vpack.c.bf16 %v306_v4, %v304_v62  ;;  %v578_v7 = vpack.c.bf16 %v326_v5, %v324_v63  ;;  %v269_v8 = vpop.f32.mrf.mxu0  ;;  %v289_v9 = vpop.f32.mrf.mxu1 }
  0xb4   : > { %602 = vst [vmem:[%s873_s25 + $0x40] sm:$0xff] %v558_v6  }
  0xb5   : > { %606 = vst [vmem:[%s873_s25 + $0x60] sm:$0xff] %v578_v7  }
  0xb9   : > { %v309_v10 = vpop.f32.mrf.mxu2  ;;  %v329_v11 = vpop.f32.mrf.mxu3 }
  0xba   : > { %v271_v12 = vpop.f32.mrf.mxu0  ;;  %v291_v13 = vpop.f32.mrf.mxu1 }
  0xbb   : > { %v523_v14 = vpack.c.bf16 %v271_v12, %v269_v8  ;;  %v543_v15 = vpack.c.bf16 %v291_v13, %v289_v9 }
  0xbd   : > { %595 = vst [vmem:[%s873_s25 + $0x8] sm:$0xff] %v523_v14  }
  0xbe   : > { %599 = vst [vmem:[%s873_s25 + $0x28] sm:$0xff] %v543_v15  }
  0xc1   : > { %v311_v16 = vpop.f32.mrf.mxu2  ;;  %v331_v17 = vpop.f32.mrf.mxu3 }
  0xc2   : > { %v563_v18 = vpack.c.bf16 %v311_v16, %v309_v10  ;;  %v583_v19 = vpack.c.bf16 %v331_v17, %v329_v11  ;;  %v274_v20 = vpop.f32.mrf.mxu0  ;;  %v294_v21 = vpop.f32.mrf.mxu1 }
  0xc4   : > { %603 = vst [vmem:[%s873_s25 + $0x48] sm:$0xff] %v563_v18  }
  0xc5   : > { %607 = vst [vmem:[%s873_s25 + $0x68] sm:$0xff] %v583_v19  }
  0xc9   : > { %v314_v22 = vpop.f32.mrf.mxu2  ;;  %v334_v23 = vpop.f32.mrf.mxu3 }
  0xca   : > { %v276_v24 = vpop.f32.mrf.mxu0  ;;  %v296_v25 = vpop.f32.mrf.mxu1 }
  0xcb   : > { %v528_v26 = vpack.c.bf16 %v276_v24, %v274_v20  ;;  %v548_v27 = vpack.c.bf16 %v296_v25, %v294_v21 }
  0xcd   : > { %596 = vst [vmem:[%s873_s25 + $0x10] sm:$0xff] %v528_v26  }
  0xce   : > { %600 = vst [vmem:[%s873_s25 + $0x30] sm:$0xff] %v548_v27  }
  0xd1   : > { %v316_v28 = vpop.f32.mrf.mxu2  ;;  %v336_v29 = vpop.f32.mrf.mxu3 }
  0xd2   : > { %v568_v30 = vpack.c.bf16 %v316_v28, %v314_v22  ;;  %v588_v31 = vpack.c.bf16 %v336_v29, %v334_v23  ;;  %v279_v32 = vpop.f32.mrf.mxu0  ;;  %v299_v33 = vpop.f32.mrf.mxu1 }
  0xd4   : > { %604 = vst [vmem:[%s873_s25 + $0x50] sm:$0xff] %v568_v30  }
  0xd5   : > { %608 = vst [vmem:[%s873_s25 + $0x70] sm:$0xff] %v588_v31  }
  0xd9   : > { %v319_v34 = vpop.f32.mrf.mxu2  ;;  %v339_v35 = vpop.f32.mrf.mxu3 }
  0xda   : > { %v281_v36 = vpop.f32.mrf.mxu0  ;;  %v301_v37 = vpop.f32.mrf.mxu1 }
  0xdb   : > { %v533_v38 = vpack.c.bf16 %v281_v36, %v279_v32  ;;  %v553_v39 = vpack.c.bf16 %v301_v37, %v299_v33 }
  0xdd   : > { %597 = vst [vmem:[%s873_s25 + $0x18] sm:$0xff] %v533_v38  }
  0xde   : > { %601 = vst [vmem:[%s873_s25 + $0x38] sm:$0xff] %v553_v39  }
  0xe1   : > { %v321_v40 = vpop.f32.mrf.mxu2  ;;  %v341_v41 = vpop.f32.mrf.mxu3 }
  0xe2   : > { %v573_v42 = vpack.c.bf16 %v321_v40, %v319_v34  ;;  %v593_v43 = vpack.c.bf16 %v341_v41, %v339_v35 }
  0xe4   : > { %605 = vst [vmem:[%s873_s25 + $0x58] sm:$0xff] %v573_v42  }
  0xe5   : > { %609 = vst [vmem:[%s873_s25 + $0x78] sm:$0xff] %v593_v43  }
  0xe6   : > { %690 = shalt.err (!%p687_p3)
}
  0xe7   : > { %s727_s17 = smov 64   ;;  %s728_s21 = smov 4  }
  0xe8   : > { %622 = dma.vmem_to_hbm [thread:$0]  (%p782_p5), %s422_s30, 2048, %s424_s3, %s409_s13, %s727_s17, %s727_s17, %s728_s21  }
  0xe9 PF: > { %p628_p4 = scmp.ge.s32.totalorder %s725_s12, 2  ;;  %s438_s22 = sand.u32 1, %s713_s9  }
  0xea   : > { %s439_s23 = scalar_lea.sflag [#allocation3], %s438_s22 }
  0xeb   : > { %p625_p7 = pnand %p628_p4, %p786_p6 }
  0xed   : > { %p626_p8 = pneg %p625_p7 }
  0xef   : > { %708 = dma.done.wait (%p626_p8), %s439_s23, 2048  }
  0xf0   : > { %710 = vsyncadd (%p626_p8), %s439_s23, 4294965248  ;;  %p12_p9 = scmp.ge.s32.totalorder %s769_s15, 4   ;;  %s930_s9 = smov %s717_s10 }
  0xf1   : > { %s931_s10 = smov %s721_s11  ;;  %s932_s11 = smov %s780_s18 }
  0xf2   : > { %s933_s12 = smov %s769_s15  ;;  %14 = sbr.rel (!%p12_p9) target bundleno = 3 (0x3), region = 63 }
  0xf7   :  { %445 = vsyncpa [#allocation3], 1 }
  0xf8   :  { %447 = vsyncpa [#allocation3 + $0x1], 1 }

</bundles_post_ra>
